<compile_context>
chip_gen: v7x
topology: tpu7x:2x2x1
jax: 0.10.0
libtpu: 0.0.40
codegen_flags: <defaults>
</compile_context>

<pallas_src>
import functools

import jax
import jax.numpy as jnp
from jax.experimental import pallas as pl
from jax.experimental.pallas import tpu as pltpu


def autoencoder_kernel(x_ref,
                       w1_ref, b1_ref, w2_ref, b2_ref, w3_ref, b3_ref,
                       w4_ref, b4_ref, w5_ref, b5_ref, w6_ref, b6_ref,
                       out_ref):
    """Whole encoder+decoder forward for one batch tile, all in VMEM.

    Weights are bf16 (MXU operand rate), biases f32; BatchNorm (eval) has been
    folded into the following Linear in the wrapper.
    """

    def lin(h, w_ref, b_ref):
        # bf16 x bf16 -> f32 accumulate on the MXU; bias add in f32 on the VPU.
        return jnp.dot(h.astype(jnp.bfloat16), w_ref[...],
                       preferred_element_type=jnp.float32) + b_ref[...]

    h = x_ref[...]                                   # bf16 (tile, D)

    # ---- encoder ----
    h = jnp.maximum(lin(h, w1_ref, b1_ref), 0.0)     # Linear(D,64)+ReLU   (BN1 folded into w2/b2)
    h = jnp.maximum(lin(h, w2_ref, b2_ref), 0.0)     # Linear(64,32)+ReLU  (BN2 folded into w3/b3)
    h = jnp.maximum(lin(h, w3_ref, b3_ref), 0.0)     # Linear(32,enc)+ReLU

    # ---- decoder ----
    h = jnp.maximum(lin(h, w4_ref, b4_ref), 0.0)     # Linear(enc,32)+ReLU (BN4 folded into w5/b5)
    h = jnp.maximum(lin(h, w5_ref, b5_ref), 0.0)     # Linear(32,64)+ReLU  (BN5 folded into w6/b6)
    z = lin(h, w6_ref, b6_ref)                       # Linear(64,D)
    out_ref[...] = jax.nn.sigmoid(z)                 # Sigmoid (single EUP transcendental)


def _bn_scale_shift(gamma, beta, mean, var, eps=1e-5):
    """Eval-mode BatchNorm1d as per-feature scale/shift (C,)."""
    scale = gamma / jnp.sqrt(var + eps)
    shift = beta - mean * scale
    return scale, shift


def fold_params(raw):
    """Fold eval-mode BatchNorm1d into the *following* Linear and cast weights
    to bf16 (MXU operands); biases stay f32.

      (relu(.) * s + t) @ W + b  ==  relu(.) @ (s[:,None] * W) + (t @ W + b)
    """
    w = {i: raw[f"w{i}"] for i in range(1, 7)}
    b = {i: raw[f"b{i}"] for i in range(1, 7)}
    for bn_tag, nxt in ((1, 2), (2, 3), (4, 5), (5, 6)):
        s, t = _bn_scale_shift(raw[f"g{bn_tag}"], raw[f"be{bn_tag}"],
                               raw[f"m{bn_tag}"], raw[f"v{bn_tag}"])
        b[nxt] = b[nxt] + t[None, :] @ w[nxt]
        w[nxt] = w[nxt] * s[:, None]
    folded = {}
    for i in range(1, 7):
        folded[f"w{i}"] = w[i].astype(jnp.bfloat16)
        folded[f"b{i}"] = b[i].astype(jnp.float32)     # (1, out)
    return folded


def init_raw_params(key, input_dim, encoding_dim=16):
    """Deterministic synthetic parameters (shapes match the PyTorch module)."""
    dims = [(input_dim, 64), (64, 32), (32, encoding_dim),
            (encoding_dim, 32), (32, 64), (64, input_dim)]
    keys = jax.random.split(key, 13)
    p = {}
    for i, (din, dout) in enumerate(dims, start=1):
        p[f"w{i}"] = jax.random.normal(keys[2 * i - 2], (din, dout),
                                       jnp.float32) * (1.0 / jnp.sqrt(din))
        p[f"b{i}"] = 0.05 * jax.random.normal(keys[2 * i - 1], (1, dout),
                                              jnp.float32)
    bn_dims = {1: 64, 2: 32, 4: 32, 5: 64}
    bkeys = jax.random.split(keys[-1], 4 * len(bn_dims))
    for j, (tag, c) in enumerate(bn_dims.items()):
        p[f"g{tag}"] = 1.0 + 0.1 * jax.random.normal(bkeys[4 * j + 0], (c,), jnp.float32)
        p[f"be{tag}"] = 0.1 * jax.random.normal(bkeys[4 * j + 1], (c,), jnp.float32)
        p[f"m{tag}"] = 0.1 * jax.random.normal(bkeys[4 * j + 2], (c,), jnp.float32)
        p[f"v{tag}"] = 1.0 + 0.1 * jax.random.uniform(bkeys[4 * j + 3], (c,), jnp.float32)
    return p


@functools.partial(jax.jit, static_argnames=("batch_tile",))
def transaction_anomaly_detector_forward(x, params, *, batch_tile=2048):
    B, D = x.shape

    # Big batch tiles amortize the ~0.35 us per-grid-step pipeline overhead and
    # fill the MXU sublane dimension.  Cap at B//2 so the parallel grid keeps
    # >= 2 steps for v7x's two TensorCores; round up to a multiple of 8
    # sublanes.  VMEM stays < 1 MiB double-buffered even at tile=2048
    # (weights < 100 KiB), well under every generation's limit.
    tile = min(batch_tile, max(8, B // 2))
    tile = ((tile + 7) // 8) * 8
    grid = pl.cdiv(B, tile)
    B_pad = grid * tile

    x = x.astype(jnp.bfloat16)                        # bf16 MXU operand + halved HBM read
    if B_pad != B:
        x = jnp.pad(x, ((0, B_pad - B), (0, 0)))

    ordered = [params[f"{k}{i}"] for i in range(1, 7) for k in ("w", "b")]

    # Constant index_map -> Pallas only DMAs each parameter block once (block
    # index never changes across the grid), so these are VMEM-resident.
    param_specs = [pl.BlockSpec(p.shape, lambda i: (0, 0)) for p in ordered]

    grid_spec = pltpu.PrefetchScalarGridSpec(
        num_scalar_prefetch=0,
        grid=(grid,),
        in_specs=[pl.BlockSpec((tile, D), lambda i: (i, 0))] + param_specs,
        out_specs=pl.BlockSpec((tile, D), lambda i: (i, 0)),
    )

    out = pl.pallas_call(
        autoencoder_kernel,
        out_shape=jax.ShapeDtypeStruct((B_pad, D), jnp.float32),
        grid_spec=grid_spec,
        compiler_params=pltpu.CompilerParams(
            dimension_semantics=("parallel",)),
    )(x, *ordered)

    return out[:B] if B_pad != B else out


def reference_forward(x, raw):
    """Pure-JAX f32 reference of the module's forward pass (BN unfolded)."""
    def bn(h, tag):
        s, t = _bn_scale_shift(raw[f"g{tag}"], raw[f"be{tag}"],
                               raw[f"m{tag}"], raw[f"v{tag}"])
        return h * s[None, :] + t[None, :]

    h = jnp.maximum(x @ raw["w1"] + raw["b1"], 0.0)
    h = bn(h, 1)
    h = jnp.maximum(h @ raw["w2"] + raw["b2"], 0.0)
    h = bn(h, 2)
    h = jnp.maximum(h @ raw["w3"] + raw["b3"], 0.0)
    h = jnp.maximum(h @ raw["w4"] + raw["b4"], 0.0)
    h = bn(h, 4)
    h = jnp.maximum(h @ raw["w5"] + raw["b5"], 0.0)
    h = bn(h, 5)
    return jax.nn.sigmoid(h @ raw["w6"] + raw["b6"])


if __name__ == "__main__":
    INPUT_DIM = 32
    ENCODING_DIM = 16
    BATCH = 64

    key = jax.random.PRNGKey(0)
    kx, kp = jax.random.split(key)
    x = jax.random.normal(kx, (BATCH, INPUT_DIM), jnp.float32)

    raw = init_raw_params(kp, INPUT_DIM, ENCODING_DIM)
    params = fold_params(raw)

    out = transaction_anomaly_detector_forward(x, params)
    out = jax.block_until_ready(out)

    ref = reference_forward(x, raw)
    assert out.shape == (BATCH, INPUT_DIM)
    err = float(jnp.max(jnp.abs(out - ref)))
    # bf16 MXU operands -> relaxed tolerance vs the f32 reference.
    assert err < 2e-2, f"mismatch vs pure-JAX reference: {err}"

    print("KERNEL_OK")
</pallas_src>

<mosaic_0001>
module attributes {stable_mosaic.version = 11 : i64} {
  func.func @autoencoder_kernel(%arg0: i32, %arg1: memref<32x32xbf16, #tpu.memory_space<vmem>>, %arg2: memref<32x64xbf16, #tpu.memory_space<vmem>>, %arg3: memref<1x64xf32, #tpu.memory_space<vmem>>, %arg4: memref<64x32xbf16, #tpu.memory_space<vmem>>, %arg5: memref<1x32xf32, #tpu.memory_space<vmem>>, %arg6: memref<32x16xbf16, #tpu.memory_space<vmem>>, %arg7: memref<1x16xf32, #tpu.memory_space<vmem>>, %arg8: memref<16x32xbf16, #tpu.memory_space<vmem>>, %arg9: memref<1x32xf32, #tpu.memory_space<vmem>>, %arg10: memref<32x64xbf16, #tpu.memory_space<vmem>>, %arg11: memref<1x64xf32, #tpu.memory_space<vmem>>, %arg12: memref<64x32xbf16, #tpu.memory_space<vmem>>, %arg13: memref<1x32xf32, #tpu.memory_space<vmem>>, %arg14: memref<32x32xf32, #tpu.memory_space<vmem>>) attributes {dimension_semantics = [#tpu.dimension_semantics<parallel>], iteration_bounds = array<i64: 2>, scalar_prefetch = 0 : i64, scratch_operands = 0 : i64, tpu.core_type = #tpu.core_type<tc>, window_params = [{transform_indices = @transform_0, window_bounds = array<i64: 32, 32>}, {pipeline_mode = #tpu.pipeline_mode<synchronous>, transform_indices = @transform_1, window_bounds = array<i64: 32, 64>}, {pipeline_mode = #tpu.pipeline_mode<synchronous>, transform_indices = @transform_2, window_bounds = array<i64: 1, 64>}, {pipeline_mode = #tpu.pipeline_mode<synchronous>, transform_indices = @transform_3, window_bounds = array<i64: 64, 32>}, {pipeline_mode = #tpu.pipeline_mode<synchronous>, transform_indices = @transform_4, window_bounds = array<i64: 1, 32>}, {pipeline_mode = #tpu.pipeline_mode<synchronous>, transform_indices = @transform_5, window_bounds = array<i64: 32, 16>}, {pipeline_mode = #tpu.pipeline_mode<synchronous>, transform_indices = @transform_6, window_bounds = array<i64: 1, 16>}, {pipeline_mode = #tpu.pipeline_mode<synchronous>, transform_indices = @transform_7, window_bounds = array<i64: 16, 32>}, {pipeline_mode = #tpu.pipeline_mode<synchronous>, transform_indices = @transform_8, window_bounds = array<i64: 1, 32>}, {pipeline_mode = #tpu.pipeline_mode<synchronous>, transform_indices = @transform_9, window_bounds = array<i64: 32, 64>}, {pipeline_mode = #tpu.pipeline_mode<synchronous>, transform_indices = @transform_10, window_bounds = array<i64: 1, 64>}, {pipeline_mode = #tpu.pipeline_mode<synchronous>, transform_indices = @transform_11, window_bounds = array<i64: 64, 32>}, {pipeline_mode = #tpu.pipeline_mode<synchronous>, transform_indices = @transform_12, window_bounds = array<i64: 1, 32>}, {transform_indices = @transform_13, window_bounds = array<i64: 32, 32>}]} {
    %c0 = arith.constant 0 : index
    %c0_0 = arith.constant 0 : index
    %0 = vector.load %arg1[%c0, %c0_0] : memref<32x32xbf16, #tpu.memory_space<vmem>>, vector<32x32xbf16>
    %c0_1 = arith.constant 0 : index
    %c0_2 = arith.constant 0 : index
    %1 = vector.load %arg2[%c0_1, %c0_2] : memref<32x64xbf16, #tpu.memory_space<vmem>>, vector<32x64xbf16>
    %cst = arith.constant dense<0.000000e+00> : vector<32x64xf32>
    %2 = tpu.matmul %0, %1, %cst {dimension_numbers = #tpu.dot_dimension_numbers<[1], [0], [0], [1], [0, 0, 1, 1], [], []>} : vector<32x32xbf16>, vector<32x64xbf16>, vector<32x64xf32> -> vector<32x64xf32>
    %c0_3 = arith.constant 0 : index
    %c0_4 = arith.constant 0 : index
    %3 = vector.load %arg3[%c0_3, %c0_4] : memref<1x64xf32, #tpu.memory_space<vmem>>, vector<1x64xf32>
    %4 = vector.broadcast %3 : vector<1x64xf32> to vector<32x64xf32>
    %5 = arith.addf %2, %4 : vector<32x64xf32>
    %cst_5 = arith.constant 0.000000e+00 : f32
    %6 = vector.broadcast %cst_5 : f32 to vector<32x64xf32>
    %7 = arith.maximumf %5, %6 : vector<32x64xf32>
    %8 = arith.truncf %7 : vector<32x64xf32> to vector<32x64xbf16>
    %c0_6 = arith.constant 0 : index
    %c0_7 = arith.constant 0 : index
    %9 = vector.load %arg4[%c0_6, %c0_7] : memref<64x32xbf16, #tpu.memory_space<vmem>>, vector<64x32xbf16>
    %cst_8 = arith.constant dense<0.000000e+00> : vector<32x32xf32>
    %10 = tpu.matmul %8, %9, %cst_8 {dimension_numbers = #tpu.dot_dimension_numbers<[1], [0], [0], [1], [0, 0, 1, 1], [], []>} : vector<32x64xbf16>, vector<64x32xbf16>, vector<32x32xf32> -> vector<32x32xf32>
    %c0_9 = arith.constant 0 : index
    %c0_10 = arith.constant 0 : index
    %11 = vector.load %arg5[%c0_9, %c0_10] : memref<1x32xf32, #tpu.memory_space<vmem>>, vector<1x32xf32>
    %12 = vector.broadcast %11 : vector<1x32xf32> to vector<32x32xf32>
    %13 = arith.addf %10, %12 : vector<32x32xf32>
    %cst_11 = arith.constant 0.000000e+00 : f32
    %14 = vector.broadcast %cst_11 : f32 to vector<32x32xf32>
    %15 = arith.maximumf %13, %14 : vector<32x32xf32>
    %16 = arith.truncf %15 : vector<32x32xf32> to vector<32x32xbf16>
    %c0_12 = arith.constant 0 : index
    %c0_13 = arith.constant 0 : index
    %17 = vector.load %arg6[%c0_12, %c0_13] : memref<32x16xbf16, #tpu.memory_space<vmem>>, vector<32x16xbf16>
    %cst_14 = arith.constant dense<0.000000e+00> : vector<32x16xf32>
    %18 = tpu.matmul %16, %17, %cst_14 {dimension_numbers = #tpu.dot_dimension_numbers<[1], [0], [0], [1], [0, 0, 1, 1], [], []>} : vector<32x32xbf16>, vector<32x16xbf16>, vector<32x16xf32> -> vector<32x16xf32>
    %c0_15 = arith.constant 0 : index
    %c0_16 = arith.constant 0 : index
    %19 = vector.load %arg7[%c0_15, %c0_16] : memref<1x16xf32, #tpu.memory_space<vmem>>, vector<1x16xf32>
    %20 = vector.broadcast %19 : vector<1x16xf32> to vector<32x16xf32>
    %21 = arith.addf %18, %20 : vector<32x16xf32>
    %cst_17 = arith.constant 0.000000e+00 : f32
    %22 = vector.broadcast %cst_17 : f32 to vector<32x16xf32>
    %23 = arith.maximumf %21, %22 : vector<32x16xf32>
    %24 = arith.truncf %23 : vector<32x16xf32> to vector<32x16xbf16>
    %c0_18 = arith.constant 0 : index
    %c0_19 = arith.constant 0 : index
    %25 = vector.load %arg8[%c0_18, %c0_19] : memref<16x32xbf16, #tpu.memory_space<vmem>>, vector<16x32xbf16>
    %cst_20 = arith.constant dense<0.000000e+00> : vector<32x32xf32>
    %26 = tpu.matmul %24, %25, %cst_20 {dimension_numbers = #tpu.dot_dimension_numbers<[1], [0], [0], [1], [0, 0, 1, 1], [], []>} : vector<32x16xbf16>, vector<16x32xbf16>, vector<32x32xf32> -> vector<32x32xf32>
    %c0_21 = arith.constant 0 : index
    %c0_22 = arith.constant 0 : index
    %27 = vector.load %arg9[%c0_21, %c0_22] : memref<1x32xf32, #tpu.memory_space<vmem>>, vector<1x32xf32>
    %28 = vector.broadcast %27 : vector<1x32xf32> to vector<32x32xf32>
    %29 = arith.addf %26, %28 : vector<32x32xf32>
    %cst_23 = arith.constant 0.000000e+00 : f32
    %30 = vector.broadcast %cst_23 : f32 to vector<32x32xf32>
    %31 = arith.maximumf %29, %30 : vector<32x32xf32>
    %32 = arith.truncf %31 : vector<32x32xf32> to vector<32x32xbf16>
    %c0_24 = arith.constant 0 : index
    %c0_25 = arith.constant 0 : index
    %33 = vector.load %arg10[%c0_24, %c0_25] : memref<32x64xbf16, #tpu.memory_space<vmem>>, vector<32x64xbf16>
    %cst_26 = arith.constant dense<0.000000e+00> : vector<32x64xf32>
    %34 = tpu.matmul %32, %33, %cst_26 {dimension_numbers = #tpu.dot_dimension_numbers<[1], [0], [0], [1], [0, 0, 1, 1], [], []>} : vector<32x32xbf16>, vector<32x64xbf16>, vector<32x64xf32> -> vector<32x64xf32>
    %c0_27 = arith.constant 0 : index
    %c0_28 = arith.constant 0 : index
    %35 = vector.load %arg11[%c0_27, %c0_28] : memref<1x64xf32, #tpu.memory_space<vmem>>, vector<1x64xf32>
    %36 = vector.broadcast %35 : vector<1x64xf32> to vector<32x64xf32>
    %37 = arith.addf %34, %36 : vector<32x64xf32>
    %cst_29 = arith.constant 0.000000e+00 : f32
    %38 = vector.broadcast %cst_29 : f32 to vector<32x64xf32>
    %39 = arith.maximumf %37, %38 : vector<32x64xf32>
    %40 = arith.truncf %39 : vector<32x64xf32> to vector<32x64xbf16>
    %c0_30 = arith.constant 0 : index
    %c0_31 = arith.constant 0 : index
    %41 = vector.load %arg12[%c0_30, %c0_31] : memref<64x32xbf16, #tpu.memory_space<vmem>>, vector<64x32xbf16>
    %cst_32 = arith.constant dense<0.000000e+00> : vector<32x32xf32>
    %42 = tpu.matmul %40, %41, %cst_32 {dimension_numbers = #tpu.dot_dimension_numbers<[1], [0], [0], [1], [0, 0, 1, 1], [], []>} : vector<32x64xbf16>, vector<64x32xbf16>, vector<32x32xf32> -> vector<32x32xf32>
    %c0_33 = arith.constant 0 : index
    %c0_34 = arith.constant 0 : index
    %43 = vector.load %arg13[%c0_33, %c0_34] : memref<1x32xf32, #tpu.memory_space<vmem>>, vector<1x32xf32>
    %44 = vector.broadcast %43 : vector<1x32xf32> to vector<32x32xf32>
    %45 = arith.addf %42, %44 : vector<32x32xf32>
    %46 = arith.negf %45 : vector<32x32xf32>
    %47 = math.exp %46 : vector<32x32xf32>
    %cst_35 = arith.constant 1.000000e+00 : f32
    %48 = vector.broadcast %cst_35 : f32 to vector<32x32xf32>
    %49 = arith.addf %48, %47 : vector<32x32xf32>
    %50 = arith.divf %48, %49 : vector<32x32xf32>
    %c0_36 = arith.constant 0 : index
    %c0_37 = arith.constant 0 : index
    %51 = vector.load %arg14[%c0_36, %c0_37] : memref<32x32xf32, #tpu.memory_space<vmem>>, vector<32x32xf32>
    tpu.vector_store %arg14[%c0_36, %c0_37], %50 {strides = array<i32>} : memref<32x32xf32, #tpu.memory_space<vmem>>, vector<32x32xf32>,
    return
  }
  func.func @transform_0(%arg0: i32) -> (i32, i32) {
    %c0_i32 = arith.constant 0 : i32
    %c0_i32_0 = arith.constant 0 : i32
    return %arg0, %c0_i32 : i32, i32
  }
  func.func @transform_1(%arg0: i32) -> (i32, i32) {
    %c0_i32 = arith.constant 0 : i32
    %c0_i32_0 = arith.constant 0 : i32
    %c0_i32_1 = arith.constant 0 : i32
    return %c0_i32, %c0_i32_0 : i32, i32
  }
  func.func @transform_2(%arg0: i32) -> (i32, i32) {
    %c0_i32 = arith.constant 0 : i32
    %c0_i32_0 = arith.constant 0 : i32
    %c0_i32_1 = arith.constant 0 : i32
    return %c0_i32, %c0_i32_0 : i32, i32
  }
  func.func @transform_3(%arg0: i32) -> (i32, i32) {
    %c0_i32 = arith.constant 0 : i32
    %c0_i32_0 = arith.constant 0 : i32
    %c0_i32_1 = arith.constant 0 : i32
    return %c0_i32, %c0_i32_0 : i32, i32
  }
  func.func @transform_4(%arg0: i32) -> (i32, i32) {
    %c0_i32 = arith.constant 0 : i32
    %c0_i32_0 = arith.constant 0 : i32
    %c0_i32_1 = arith.constant 0 : i32
    return %c0_i32, %c0_i32_0 : i32, i32
  }
  func.func @transform_5(%arg0: i32) -> (i32, i32) {
    %c0_i32 = arith.constant 0 : i32
    %c0_i32_0 = arith.constant 0 : i32
    %c0_i32_1 = arith.constant 0 : i32
    return %c0_i32, %c0_i32_0 : i32, i32
  }
  func.func @transform_6(%arg0: i32) -> (i32, i32) {
    %c0_i32 = arith.constant 0 : i32
    %c0_i32_0 = arith.constant 0 : i32
    %c0_i32_1 = arith.constant 0 : i32
    return %c0_i32, %c0_i32_0 : i32, i32
  }
  func.func @transform_7(%arg0: i32) -> (i32, i32) {
    %c0_i32 = arith.constant 0 : i32
    %c0_i32_0 = arith.constant 0 : i32
    %c0_i32_1 = arith.constant 0 : i32
    return %c0_i32, %c0_i32_0 : i32, i32
  }
  func.func @transform_8(%arg0: i32) -> (i32, i32) {
    %c0_i32 = arith.constant 0 : i32
    %c0_i32_0 = arith.constant 0 : i32
    %c0_i32_1 = arith.constant 0 : i32
    return %c0_i32, %c0_i32_0 : i32, i32
  }
  func.func @transform_9(%arg0: i32) -> (i32, i32) {
    %c0_i32 = arith.constant 0 : i32
    %c0_i32_0 = arith.constant 0 : i32
    %c0_i32_1 = arith.constant 0 : i32
    return %c0_i32, %c0_i32_0 : i32, i32
  }
  func.func @transform_10(%arg0: i32) -> (i32, i32) {
    %c0_i32 = arith.constant 0 : i32
    %c0_i32_0 = arith.constant 0 : i32
    %c0_i32_1 = arith.constant 0 : i32
    return %c0_i32, %c0_i32_0 : i32, i32
  }
  func.func @transform_11(%arg0: i32) -> (i32, i32) {
    %c0_i32 = arith.constant 0 : i32
    %c0_i32_0 = arith.constant 0 : i32
    %c0_i32_1 = arith.constant 0 : i32
    return %c0_i32, %c0_i32_0 : i32, i32
  }
  func.func @transform_12(%arg0: i32) -> (i32, i32) {
    %c0_i32 = arith.constant 0 : i32
    %c0_i32_0 = arith.constant 0 : i32
    %c0_i32_1 = arith.constant 0 : i32
    return %c0_i32, %c0_i32_0 : i32, i32
  }
  func.func @transform_13(%arg0: i32) -> (i32, i32) {
    %c0_i32 = arith.constant 0 : i32
    %c0_i32_0 = arith.constant 0 : i32
    return %arg0, %c0_i32 : i32, i32
  }
}

</mosaic_0001>

<bundles_post_ra>
// kernel: transaction_anomaly_detector_forward.1
= control target key start
LH: loop header
LB: loop body
LE: loop exit
PB: predicated region body
PF: predicated region fallthrough
CT: control target
= control target key end

     0   :  { %s1318_s25 = smov 0   ;;  %s1416_s0 = inlined_call_operand.vmem [shape: bf16[64,32], index: 0, kind: input, shape index: {}]   ;;  %s1417_s1 = inlined_call_operand.vmem [shape: bf16[32,64], index: 1, kind: input, shape index: {}]   ;;  %s1418_s2 = inlined_call_operand.vmem [shape: f32[1,64], index: 2, kind: input, shape index: {}]   ;;  %s1419_s3 = inlined_call_operand.vmem [shape: bf16[64,32], index: 3, kind: input, shape index: {}]   ;;  %s1420_s4 = inlined_call_operand.vmem [shape: f32[1,32], index: 4, kind: input, shape index: {}]   ;;  %s1421_s5 = inlined_call_operand.vmem [shape: bf16[32,16], index: 5, kind: input, shape index: {}]   ;;  %s1422_s6 = inlined_call_operand.vmem [shape: f32[1,16], index: 6, kind: input, shape index: {}]   ;;  %s1423_s7 = inlined_call_operand.vmem [shape: bf16[16,32], index: 7, kind: input, shape index: {}]   ;;  %s1424_s8 = inlined_call_operand.vmem [shape: f32[1,32], index: 8, kind: input, shape index: {}]   ;;  %s1425_s9 = inlined_call_operand.vmem [shape: bf16[32,64], index: 9, kind: input, shape index: {}]   ;;  %s1426_s10 = inlined_call_operand.vmem [shape: f32[1,64], index: 10, kind: input, shape index: {}]   ;;  %s1427_s11 = inlined_call_operand.vmem [shape: bf16[64,32], index: 11, kind: input, shape index: {}]   ;;  %s1428_s12 = inlined_call_operand.vmem [shape: f32[1,32], index: 12, kind: input, shape index: {}]   ;;  %s1429_s13 = inlined_call_operand.vmem [shape: f32[64,32], index: 13, kind: output, shape index: {}]  }
   0x1 LB: > { %s1068_s26 = sadd.s32 4294967295, %s1246_s25   ;;  %p1072_p0 = scmp.ge.s32.totalorder %s1246_s25, 1  ;;  %s1246_s25 = sphi %s1318_s25, %s23_s25  }
   0x2   : > { %p388_p1 = scmp.lt.s32.totalorder %s1246_s25, 3 }
   0x4   : > { %p389_p2 = pnand %p1072_p0, %p388_p1 }
   0x5   : > { %v1207_v0 = vld [vmem:[%s1417_s1] sm:$0xff] (!%p389_p2)   ;;  %s1073_s29 = sshll.u32 (!%p389_p2), %s1068_s26, 2  ;;  %v1208_v1 = vld [vmem:[%s1417_s1 + $0x8] sm:$0xff] (!%p389_p2)   ;;  %vm482_vm0 = vcmask (!%p389_p2), 261120   ;;  %v1213_v6 = vld [vmem:[%s1419_s3 + $0x10] sm:$0xff] (!%p389_p2)   ;;  %vm583_vm1 = vcmask (!%p389_p2), 523264  }
   0x6   : > { %392 = sbr.rel (%p389_p2) target bundleno = 1374 (0x55e), region = 72  ;;  %p433_p3 = scmp.lt.s32.totalorder (!%p389_p2), %s1073_s29, 7  ;;  %1145 = vmatprep.subr.bf16.mxu1 (!%p389_p2), %v1207_v0  ;;  %v1211_v2 = vld [vmem:[%s1419_s3] sm:$0xff] (!%p389_p2)   ;;  %v1212_v3 = vld [vmem:[%s1419_s3 + $0x8] sm:$0xff] (!%p389_p2)   ;;  %v1214_v7 = vld [vmem:[%s1419_s3 + $0x18] sm:$0xff] (!%p389_p2)   ;;  %vm744_vm2 = vcmask (!%p389_p2), 130048  }
   0x7   : > { %1146 = vmatpush3.bf16.msra.mxu1 (!%p389_p2), %v1207_v0  ;;  %v1077_v8 = vld [vmem:[%s1418_s2] ss:$0 sm:$0xff] (!%p389_p2)  ;;  %v1216_v24 = vld [vmem:[%s1421_s5 + $0x8] sm:$0xff] (!%p389_p2)  }
   0x8   : > { %1147 = vmatprep.subr.bf16.mxu1 (!%p389_p2), %v1208_v1  ;;  %v1215_v23 = vld [vmem:[%s1421_s5] sm:$0xff] (!%p389_p2)   ;;  %v1219_v57 = vld [vmem:[%s1425_s9 + $0x8] sm:$0xff] (!%p389_p2)  }
   0x9   : > { %1165 = vmatprep.subr.bf16.mxu0 (!%p389_p2), %v1215_v23  ;;  %v1084_v25 = vld [vmem:[%s1420_s4] ss:$0 sm:$0xff] (!%p389_p2)  ;;  %v1221_v59 = vld [vmem:[%s1427_s11 + $0x8] sm:$0xff] (!%p389_p2)  }
   0xa   : > { %1166 = vmatpush3.bf16.msra.mxu0 (!%p389_p2), %v1215_v23  ;;  %v1217_v40 = vld [vmem:[%s1423_s7] sm:$0xff] (!%p389_p2)  }
   0xb   : > { %1148 = vmatpush3.bf16.msra.mxu1 (!%p389_p2), %v1208_v1  ;;  %1167 = vmatprep.subr.bf16.mxu0 (!%p389_p2), %v1216_v24  ;;  %v1091_v41 = vld [vmem:[%s1422_s6] ss:$0 sm:$0xff] (!%p389_p2) }
   0xc   : > { %1153 = vmatprep.subr.bf16.mxu1 (!%p389_p2), %v1211_v2  ;;  %v1218_v56 = vld [vmem:[%s1425_s9] sm:$0xff] (!%p389_p2)  }
   0xd   : > { %s1431_s29 = smov (!%p433_p3, %s1073_s29), 7  ;;  %v1220_v58 = vld [vmem:[%s1427_s11] sm:$0xff]  }
   0xe   : > { %s1074_s17 = sshll.u32 %s1431_s29, 2  ;;  %1168 = vmatpush3.bf16.msra.mxu0 %v1216_v24  ;;  %v1096_v60 = vld [vmem:[%s1424_s8] ss:$0 sm:$0xff]  ;;  %s1076_s28 = sshll.u32 %s1431_s29, 3 }
   0xf   : > { %s436_s20 = scalar_lea.vmem %s1416_s0, %s1074_s17  ;;  %1173 = vmatprep.subr.bf16.mxu0 %v1217_v40  ;;  %s442_s15 = scalar_lea.vmem %s1429_s13, %s1076_s28 }
  0x10   : > { %v1209_v4 = vld [vmem:[%s436_s20] sm:$0xff]   ;;  %v1210_v5 = vld [vmem:[%s436_s20 + $0x8] sm:$0xff]  }
  0x11   : > { %1149 = vmatprep.mubr.msk.bf16.mxu1 %vm482_vm0, %v1209_v4 }
  0x12   : > { %1150 = vmatmul.mubr.msk.bf16.vlgmr.msra.gmra.mrb[0].mxu1 %vm482_vm0, %v1210_v5 }
  0x13   : > { %1154 = vmatpush3.bf16.msra.mxu1 %v1211_v2 }
  0x14   : > { %1155 = vmatprep.subr.bf16.mxu1 %v1212_v3 }
  0x17   : > { %1156 = vmatpush3.bf16.msra.mxu1 %v1212_v3 }
  0x18   : > { %1157 = vmatprep.subr.bf16.mxu1 %v1213_v6 }
  0x1b   : > { %1158 = vmatpush3.bf16.msra.mxu1 %v1213_v6 }
  0x1c   : > { %1159 = vmatprep.subr.bf16.mxu1 %v1214_v7 }
  0x1f   : > { %1160 = vmatpush3.bf16.msra.mxu1 %v1214_v7 }
  0x20   : > { %1179 = vmatprep.subr.bf16.mxu1 %v1218_v56 }
  0xe5   : > { %v1151_v9 = vpop.f32.mrb[0].mxu1 }
  0xe6   : > { %v532_v10 = vadd.f32 %v1151_v9, %v1077_v8  ;;  %v523_v11 = vpop.f32.mrb[1].mxu1 }
  0xe7   : > { %v524_v12 = vadd.f32 %v1077_v8, %v523_v11  ;;  %v1152_v13 = vpop.f32.mrb[2].mxu1  ;;  %v1222_v11 = vld [vmem:[%s1427_s11 + $0x10] sm:$0xff]  }
  0xe8   : > { %v535_v14 = vadd.f32 %v1152_v13, %v1077_v8  ;;  %v526_v15 = vpop.f32.mrb[3].mxu1  ;;  %v540_v17 = vmax.f32 %v532_v10, 0.0  ;;  %v1100_v13 = vld [vmem:[%s1426_s10] ss:$0 sm:$0xff] }
  0xe9   : > { %v527_v16 = vadd.f32 %v1077_v8, %v526_v15  ;;  %v538_v19 = vmax.f32 %v524_v12, 0.0  ;;  %v1223_v12 = vld [vmem:[%s1427_s11 + $0x18] sm:$0xff]  }
  0xea   : > { %v541_v18 = vmax.f32 %v535_v14, 0.0 }
  0xeb   : > { %v539_v20 = vmax.f32 %v527_v16, 0.0 }
  0xec   : > { %v543_v21 = vpack.c.bf16 %v541_v18, %v540_v17 }
  0xed   : > { %v542_v22 = vpack.c.bf16 %v539_v20, %v538_v19 }
  0xef   : > { %1161 = vmatprep.mubr.msk.bf16.mxu1 %vm583_vm1, %v542_v22 }
  0xf0   : > { %1162 = vmatmul.mubr.msk.bf16.vlgmr.msra.gmra.mrb[4].mxu1 %vm583_vm1, %v543_v21 }
  0xf1   : > { %1180 = vmatpush3.bf16.msra.mxu1 %v1218_v56 }
  0xf2   : > { %1181 = vmatprep.subr.bf16.mxu1 %v1219_v57 }
  0xf5   : > { %1182 = vmatpush3.bf16.msra.mxu1 %v1219_v57 }
 0x1c3   : > { %v1163_v26 = vpop.f32.mrb[4].mxu1 }
 0x1c4   : > { %v633_v27 = vadd.f32 %v1163_v26, %v1084_v25  ;;  %v624_v28 = vpop.f32.mrb[5].mxu1 }
 0x1c5   : > { %v625_v29 = vadd.f32 %v1084_v25, %v624_v28  ;;  %v1164_v30 = vpop.f32.mrb[6].mxu1  ;;  %v1105_v28 = vld [vmem:[%s1428_s12] ss:$0 sm:$0xff] }
 0x1c6   : > { %v636_v31 = vadd.f32 %v1164_v30, %v1084_v25  ;;  %v627_v32 = vpop.f32.mrb[7].mxu1  ;;  %v641_v34 = vmax.f32 %v633_v27, 0.0 }
 0x1c7   : > { %v628_v33 = vadd.f32 %v1084_v25, %v627_v32  ;;  %v639_v36 = vmax.f32 %v625_v29, 0.0 }
 0x1c8   : > { %v642_v35 = vmax.f32 %v636_v31, 0.0 }
 0x1c9   : > { %v640_v37 = vmax.f32 %v628_v33, 0.0 }
 0x1ca   : > { %v644_v38 = vpack.c.bf16 %v642_v35, %v641_v34 }
 0x1cb   : > { %v643_v39 = vpack.c.bf16 %v640_v37, %v639_v36 }
 0x1cd   : > { %1169 = vmatprep.mubr.msk.bf16.mxu0 %vm482_vm0, %v643_v39 }
 0x1ce   : > { %1170 = vmatmul.mubr.msk.bf16.vlgmr.msra.gmra.mrb[0].mxu0 %vm482_vm0, %v644_v38 }
 0x1cf   : > { %1174 = vmatpush3.bf16.msra.mxu0 %v1217_v40 }
 0x1d0   : > { %1187 = vmatprep.subr.bf16.mxu0 %v1220_v58 }
 0x2a1   : > { %v1171_v42 = vpop.f32.mrb[0].mxu0 }
 0x2a2   : > { %v717_v43 = vadd.f32 %v1171_v42, %v1091_v41  ;;  %v708_v44 = vpop.f32.mrb[1].mxu0 }
 0x2a3   : > { %v709_v45 = vadd.f32 %v1091_v41, %v708_v44  ;;  %v1172_v46 = vpop.f32.mrb[2].mxu0 }
 0x2a4   : > { %v720_v47 = vadd.f32 %v1172_v46, %v1091_v41  ;;  %v711_v48 = vpop.f32.mrb[3].mxu0  ;;  %v725_v50 = vmax.f32 %v717_v43, 0.0 }
 0x2a5   : > { %v712_v49 = vadd.f32 %v1091_v41, %v711_v48  ;;  %v723_v52 = vmax.f32 %v709_v45, 0.0 }
 0x2a6   : > { %v726_v51 = vmax.f32 %v720_v47, 0.0 }
 0x2a7   : > { %v724_v53 = vmax.f32 %v712_v49, 0.0 }
 0x2a8   : > { %v728_v54 = vpack.c.bf16 %v726_v51, %v725_v50 }
 0x2a9   : > { %v727_v55 = vpack.c.bf16 %v724_v53, %v723_v52 }
 0x2ab   : > { %1175 = vmatprep.mubr.msk.bf16.mxu0 %vm744_vm2, %v727_v55 }
 0x2ac   : > { %1176 = vmatmul.mubr.msk.bf16.vlgmr.msra.gmra.mrb[4].mxu0 %vm744_vm2, %v728_v54 }
 0x2ad   : > { %1188 = vmatpush3.bf16.msra.mxu0 %v1220_v58 }
 0x2ae   : > { %1189 = vmatprep.subr.bf16.mxu0 %v1221_v59 }
 0x2b1   : > { %1190 = vmatpush3.bf16.msra.mxu0 %v1221_v59 }
 0x2b2   : > { %1191 = vmatprep.subr.bf16.mxu0 %v1222_v11 }
 0x2b5   : > { %1192 = vmatpush3.bf16.msra.mxu0 %v1222_v11 }
 0x2b6   : > { %1193 = vmatprep.subr.bf16.mxu0 %v1223_v12 }
 0x2b9   : > { %1194 = vmatpush3.bf16.msra.mxu0 %v1223_v12 }
 0x37f   : > { %v1177_v61 = vpop.f32.mrb[4].mxu0 }
 0x380   : > { %v794_v62 = vadd.f32 %v1177_v61, %v1096_v60  ;;  %v785_v63 = vpop.f32.mrb[5].mxu0 }
 0x381   : > { %v786_v0 = vadd.f32 %v1096_v60, %v785_v63  ;;  %v1178_v1 = vpop.f32.mrb[6].mxu0 }
 0x382   : > { %v797_v2 = vadd.f32 %v1178_v1, %v1096_v60  ;;  %v788_v3 = vpop.f32.mrb[7].mxu0  ;;  %v802_v5 = vmax.f32 %v794_v62, 0.0 }
 0x383   : > { %v789_v4 = vadd.f32 %v1096_v60, %v788_v3  ;;  %v800_v7 = vmax.f32 %v786_v0, 0.0 }
 0x384   : > { %v803_v6 = vmax.f32 %v797_v2, 0.0 }
 0x385   : > { %v801_v8 = vmax.f32 %v789_v4, 0.0 }
 0x386   : > { %v805_v9 = vpack.c.bf16 %v803_v6, %v802_v5 }
 0x387   : > { %v804_v10 = vpack.c.bf16 %v801_v8, %v800_v7 }
 0x389   : > { %1183 = vmatprep.mubr.msk.bf16.mxu1 %vm482_vm0, %v804_v10 }
 0x38a   : > { %1184 = vmatmul.mubr.msk.bf16.vlgmr.msra.gmra.mrb[8].mxu1 %vm482_vm0, %v805_v9 }
 0x45d   : > { %v1185_v14 = vpop.f32.mrb[8].mxu1 }
 0x45e   : > { %v878_v15 = vadd.f32 %v1185_v14, %v1100_v13  ;;  %v869_v16 = vpop.f32.mrb[9].mxu1 }
 0x45f   : > { %v870_v17 = vadd.f32 %v1100_v13, %v869_v16  ;;  %v1186_v18 = vpop.f32.mrb[10].mxu1 }
 0x460   : > { %v881_v19 = vadd.f32 %v1186_v18, %v1100_v13  ;;  %v872_v20 = vpop.f32.mrb[11].mxu1  ;;  %v886_v22 = vmax.f32 %v878_v15, 0.0 }
 0x461   : > { %v873_v21 = vadd.f32 %v1100_v13, %v872_v20  ;;  %v884_v24 = vmax.f32 %v870_v17, 0.0 }
 0x462   : > { %v887_v23 = vmax.f32 %v881_v19, 0.0 }
 0x463   : > { %v885_v25 = vmax.f32 %v873_v21, 0.0 }
 0x464   : > { %v889_v26 = vpack.c.bf16 %v887_v23, %v886_v22 }
 0x465   : > { %v888_v27 = vpack.c.bf16 %v885_v25, %v884_v24 }
 0x467   : > { %1195 = vmatprep.mubr.msk.bf16.mxu0 %vm583_vm1, %v888_v27 }
 0x468   : > { %1196 = vmatmul.mubr.msk.bf16.vlgmr.msra.gmra.mrb[8].mxu0 %vm583_vm1, %v889_v26 }
 0x53b   : > { %v1197_v29 = vpop.f32.mrb[8].mxu0 }
 0x53c   : > { %v978_v30 = vadd.f32 %v1197_v29, %v1105_v28  ;;  %v969_v31 = vpop.f32.mrb[9].mxu0 }
 0x53d   : > { %v970_v32 = vadd.f32 %v1105_v28, %v969_v31  ;;  %v1198_v33 = vpop.f32.mrb[10].mxu0 }
 0x53e   : > { %v1114_v34 = vmul.f32 -1.442695, %v978_v30  ;;  %v981_v35 = vadd.f32 %v1198_v33, %v1105_v28  ;;  %v972_v36 = vpop.f32.mrb[11].mxu0 }
 0x53f   : > { %v1112_v37 = vmul.f32 -1.442695, %v970_v32  ;;  %v973_v38 = vadd.f32 %v1105_v28, %v972_v36 }
 0x540   : > { %1224 = vpow2.f32 %v1114_v34  ;;  %v1115_v39 = vmul.f32 -1.442695, %v981_v35 }
 0x541   : > { %1226 = vpow2.f32 %v1112_v37  ;;  %v1113_v40 = vmul.f32 -1.442695, %v973_v38 }
 0x542   : > { %1228 = vpow2.f32 %v1115_v39 }
 0x543   : > { %1230 = vpow2.f32 %v1113_v40 }
 0x54a   : > { %v1225_v41 = vpop.eup %1224 }
 0x54b   : > { %v1227_v42 = vpop.eup %1226  ;;  %v998_v46 = vadd.f32 1.0, %v1225_v41 }
 0x54c   : > { %v1229_v43 = vpop.eup %1228  ;;  %v996_v44 = vadd.f32 1.0, %v1227_v42 }
 0x54d   : > { %v1231_v45 = vpop.eup %1230  ;;  %v999_v47 = vadd.f32 1.0, %v1229_v43 }
 0x54e   : > { %1232 = vrcp.f32 %v996_v44  ;;  %v997_v48 = vadd.f32 1.0, %v1231_v45 }
 0x550   : > { %1234 = vrcp.f32 %v997_v48 }
 0x551   : > { %1236 = vrcp.f32 %v998_v46 }
 0x552   : > { %1238 = vrcp.f32 %v999_v47 }
 0x558   : > { %v1233_v49 = vpop.eup %1232 }
 0x559   : > { %1008 = vst.msk [vmem:[%s442_s15] sm:$0xff] %vm482_vm0, %v1233_v49 }
 0x55a   : > { %v1235_v50 = vpop.eup %1234 }
 0x55b   : > { %v1237_v51 = vpop.eup %1236  ;;  %1009 = vst.msk [vmem:[%s442_s15 + $0x8] sm:$0xff] %vm482_vm0, %v1235_v50 }
 0x55c   : > { %v1239_v52 = vpop.eup %1238  ;;  %1010 = vst.msk [vmem:[%s442_s15 + $0x10] sm:$0xff] %vm482_vm0, %v1237_v51 }
 0x55d   : > { %1011 = vst.msk [vmem:[%s442_s15 + $0x18] sm:$0xff] %vm482_vm0, %v1239_v52 }
 0x55e PF: > { %s23_s25 = sadd.s32 1, %s1246_s25  }
 0x55f   : > { %p20_p4 = scmp.ge.s32.totalorder %s23_s25, 4  }
 0x561   :  { %22 = sbr.rel (!%p20_p4) target bundleno = 1 (0x1), region = 102 }

</bundles_post_ra>
